<compile_context>
chip_gen: v5e
topology: v5e:2x2
jax: 0.10.0
libtpu: 0.0.40
codegen_flags: <defaults>
</compile_context>

<pallas_src>
import functools

import numpy as np
import jax
import jax.numpy as jnp
from jax.experimental import pallas as pl
from jax.experimental.pallas import tpu as pltpu


# ----------------------------- Pallas kernel -----------------------------

def _ddepthwise_kernel(x_ref, w1_ref, s1_ref, w2_ref, s2_ref, o_ref,
                       xp_scr, y1p_scr, *, H, W, Cin, Cout):
    """Fused DDepthwise forward for one image.

    x_ref   : (1, H, W*Cin)              lane-packed NHWC input
    w1_ref  : (3, (W+2)*Cin,  W*Cout)    stage-1 banded folded weights (per ky)
    s1_ref  : (1, W*Cout)                stage-1 folded bias/BN shift (tiled over W)
    w2_ref  : (3, (W+2)*Cout, W*Cout)    stage-2 banded folded weights (per ky)
    s2_ref  : (1, W*Cout)                stage-2 folded bias/BN shift (tiled over W)
    o_ref   : (1, H, W*Cout)             lane-packed output
    xp_scr  : VMEM (H+2, (W+2)*Cin)      stage-1 padded input scratch
    y1p_scr : VMEM (H+2, (W+2)*Cout)     stage-2 padded activation scratch
    """
    WCin = W * Cin
    WCout = W * Cout

    # ---- stage 1: dw3x3 -> 1x1 -> BN -> ReLU (one banded matmul per ky) ----
    xp_scr[...] = jnp.zeros_like(xp_scr)                      # halo zeros
    xp_scr[1:H + 1, Cin:Cin + WCin] = x_ref[0]                # interior copy

    acc1 = jnp.zeros((H, WCout), jnp.float32)
    for ky in range(3):                                       # 3 MXU matmuls
        acc1 = acc1 + jnp.dot(xp_scr[ky:ky + H, :], w1_ref[ky],
                              preferred_element_type=jnp.float32)
    y1 = jnp.maximum(acc1 + s1_ref[...], 0.0)                 # (H, W*Cout), lane-dense

    # ---- stage 2: grouped3x3 -> 1x1 -> BN -> ReLU ----
    y1p_scr[...] = jnp.zeros_like(y1p_scr)
    y1p_scr[1:H + 1, Cout:Cout + WCout] = y1

    acc2 = jnp.zeros((H, WCout), jnp.float32)
    for ky in range(3):
        acc2 = acc2 + jnp.dot(y1p_scr[ky:ky + H, :], w2_ref[ky],
                              preferred_element_type=jnp.float32)
    y2 = jnp.maximum(acc2 + s2_ref[...], 0.0)

    o_ref[0] = y2.astype(o_ref.dtype)                         # dense 128-lane store


def _ddepthwise_pallas(x_packed, w1, s1, w2, s2, *, H, W, Cin, Cout):
    """x_packed: (N, H, W*Cin) f32 -> (N, H, W*Cout) f32."""
    N = x_packed.shape[0]
    kernel = functools.partial(_ddepthwise_kernel, H=H, W=W, Cin=Cin, Cout=Cout)
    return pl.pallas_call(
        kernel,
        out_shape=jax.ShapeDtypeStruct((N, H, W * Cout), jnp.float32),
        grid=(N,),
        in_specs=[
            pl.BlockSpec((1, H, W * Cin), lambda n: (n, 0, 0)),
            pl.BlockSpec((3, (W + 2) * Cin, W * Cout), lambda n: (0, 0, 0)),
            pl.BlockSpec((1, W * Cout), lambda n: (0, 0)),
            pl.BlockSpec((3, (W + 2) * Cout, W * Cout), lambda n: (0, 0, 0)),
            pl.BlockSpec((1, W * Cout), lambda n: (0, 0)),
        ],
        out_specs=pl.BlockSpec((1, H, W * Cout), lambda n: (n, 0, 0)),
        scratch_shapes=[
            pltpu.VMEM((H + 2, (W + 2) * Cin), jnp.float32),
            pltpu.VMEM((H + 2, (W + 2) * Cout), jnp.float32),
        ],
        compiler_params=pltpu.CompilerParams(
            dimension_semantics=("parallel",)),   # N images across cores (v7x: 2 TCs)
    )(x_packed, w1, s1, w2, s2)


# ------------------- host-side weight folding (glue, numpy) -------------------

def _band_weights(wf, W):
    """wf: (3, 3, Cin, Cout) folded per-tap channel mix -> (3, (W+2)*Cin, W*Cout).

    big[ky, (w+kx)*Cin + ci, w*Cout + co] = wf[ky, kx, ci, co]
    so a single matmul of a padded lane-packed row band against big[ky] performs
    the horizontal taps + channel contraction of the 3x3 conv, the 1x1 conv and
    the BN scale in one shot.
    """
    Cin, Cout = wf.shape[2], wf.shape[3]
    big = np.zeros((3, (W + 2) * Cin, W * Cout), np.float32)
    for ky in range(3):
        for kx in range(3):
            for w in range(W):
                big[ky,
                    (w + kx) * Cin:(w + kx + 1) * Cin,
                    w * Cout:(w + 1) * Cout] = wf[ky, kx]
    return big


def _fold_weights(p, in_channels, W, eps=1e-5):
    """Fold conv3x3 -> conv1x1 -> BN (inference) into banded weights + shifts."""
    Cin = in_channels
    Cout = int(p["pw1_w"].shape[0])
    assert Cout % Cin == 0, "grouped conv requires out_channels % in_channels == 0"

    scale1 = np.asarray(p["bn1_g"]) / np.sqrt(np.asarray(p["bn1_v"]) + eps)
    shift1 = np.asarray(p["bn1_b"]) - np.asarray(p["bn1_m"]) * scale1
    scale2 = np.asarray(p["bn2_g"]) / np.sqrt(np.asarray(p["bn2_v"]) + eps)
    shift2 = np.asarray(p["bn2_b"]) - np.asarray(p["bn2_m"]) * scale2

    # stage 1: depthwise (groups=Cin) taps are diagonal -> fold through 1x1 + BN scale
    d = np.asarray(p["dw1_w"])[:, 0, :, :]                    # (Cin, 3, 3)
    pw1 = np.asarray(p["pw1_w"])[:, :, 0, 0].T                # (Cin, Cout)
    wf1 = np.einsum("iyx,io,o->yxio", d, pw1, scale1)         # (3,3,Cin,Cout)
    sh1 = (np.asarray(p["dw1_b"]) @ pw1 + np.asarray(p["pw1_b"])) * scale1 + shift1

    # stage 2: grouped (groups=Cin) taps are block-diagonal -> fold through 1x1 + BN
    g2 = np.asarray(p["g2_w"])                                # (Cout, Cout//Cin, 3, 3)
    cin_g = g2.shape[1]
    cout_g = Cout // Cin
    taps2 = np.zeros((3, 3, Cout, Cout), np.float32)          # [ky, kx, ci, cm]
    for cm in range(Cout):
        gidx = cm // cout_g
        for cil in range(cin_g):
            taps2[:, :, gidx * cin_g + cil, cm] = g2[cm, cil]
    pw2 = np.asarray(p["pw2_w"])[:, :, 0, 0].T                # (Cout, Cout)
    wf2 = np.einsum("yxim,mo,o->yxio", taps2, pw2, scale2)    # (3,3,Cout,Cout)
    sh2 = (np.asarray(p["g2_b"]) @ pw2 + np.asarray(p["pw2_b"])) * scale2 + shift2

    w1_band = _band_weights(wf1.astype(np.float32), W)
    w2_band = _band_weights(wf2.astype(np.float32), W)
    s1_t = np.tile(sh1.astype(np.float32), W).reshape(1, W * Cout)
    s2_t = np.tile(sh2.astype(np.float32), W).reshape(1, W * Cout)
    return (jnp.asarray(w1_band), jnp.asarray(s1_t),
            jnp.asarray(w2_band), jnp.asarray(s2_t))


def ddepthwise_forward(x_nchw, p, in_channels):
    N, Cin, H, W = x_nchw.shape
    Cout = int(p["pw1_w"].shape[0])
    # NCHW -> NHWC -> lane-pack channels with W: (N, H, W*Cin)
    x_packed = jnp.transpose(x_nchw, (0, 2, 3, 1)).reshape(N, H, W * Cin)
    x_packed = x_packed.astype(jnp.float32)

    w1, s1, w2, s2 = _fold_weights(p, in_channels, W)
    out_packed = _ddepthwise_pallas(x_packed, w1, s1, w2, s2,
                                    H=H, W=W, Cin=Cin, Cout=Cout)
    out = out_packed.reshape(N, H, W, Cout)
    return jnp.transpose(out, (0, 3, 1, 2))                   # NHWC -> NCHW


# ------------------------- parameter init (matches nn.Module) -------------------------

def init_params(key, in_channels, out_channels):
    ks = jax.random.split(key, 16)
    rn = lambda k, shape, s=0.1: s * jax.random.normal(k, shape, jnp.float32)
    p = {}
    # Conv2d(Cin, Cin, 3, 1, 1, groups=Cin)
    p["dw1_w"] = rn(ks[0], (in_channels, 1, 3, 3))
    p["dw1_b"] = rn(ks[1], (in_channels,))
    # Conv2d(Cin, Cout, 1)
    p["pw1_w"] = rn(ks[2], (out_channels, in_channels, 1, 1))
    p["pw1_b"] = rn(ks[3], (out_channels,))
    # BatchNorm2d(Cout) (inference stats)
    p["bn1_g"] = 1.0 + rn(ks[4], (out_channels,))
    p["bn1_b"] = rn(ks[5], (out_channels,))
    p["bn1_m"] = rn(ks[6], (out_channels,))
    p["bn1_v"] = 0.5 + jax.random.uniform(ks[7], (out_channels,), jnp.float32)
    # Conv2d(Cout, Cout, 3, 1, 1, groups=Cin)
    p["g2_w"] = rn(ks[8], (out_channels, out_channels // in_channels, 3, 3))
    p["g2_b"] = rn(ks[9], (out_channels,))
    # Conv2d(Cout, Cout, 1)
    p["pw2_w"] = rn(ks[10], (out_channels, out_channels, 1, 1))
    p["pw2_b"] = rn(ks[11], (out_channels,))
    # BatchNorm2d(Cout)
    p["bn2_g"] = 1.0 + rn(ks[12], (out_channels,))
    p["bn2_b"] = rn(ks[13], (out_channels,))
    p["bn2_m"] = rn(ks[14], (out_channels,))
    p["bn2_v"] = 0.5 + jax.random.uniform(ks[15], (out_channels,), jnp.float32)
    return p


# ------------------------- pure-JAX reference (self-check) -------------------------

def _ref_forward(x_nchw, p, in_channels, eps=1e-5):
    def conv(x, w, b, groups, pad):
        y = jax.lax.conv_general_dilated(
            x, w, window_strides=(1, 1), padding=[(pad, pad), (pad, pad)],
            dimension_numbers=("NCHW", "OIHW", "NCHW"),
            feature_group_count=groups)
        return y + b[None, :, None, None]

    def bn(x, g, b, m, v):
        return ((x - m[None, :, None, None])
                * (g / jnp.sqrt(v + eps))[None, :, None, None]
                + b[None, :, None, None])

    y = conv(x_nchw, p["dw1_w"], p["dw1_b"], in_channels, 1)
    y = conv(y, p["pw1_w"], p["pw1_b"], 1, 0)
    y = jnp.maximum(bn(y, p["bn1_g"], p["bn1_b"], p["bn1_m"], p["bn1_v"]), 0.0)
    y = conv(y, p["g2_w"], p["g2_b"], in_channels, 1)
    y = conv(y, p["pw2_w"], p["pw2_b"], 1, 0)
    y = jnp.maximum(bn(y, p["bn2_g"], p["bn2_b"], p["bn2_m"], p["bn2_v"]), 0.0)
    return y


if __name__ == "__main__":
    N, CIN, COUT, H, W = 2, 4, 8, 16, 16

    key = jax.random.PRNGKey(0)
    kx_, kp = jax.random.split(key)
    x = jax.random.normal(kx_, (N, CIN, H, W), jnp.float32)   # PyTorch NCHW input
    params = init_params(kp, CIN, COUT)

    out = jax.block_until_ready(ddepthwise_forward(x, params, CIN))

    ref = jax.block_until_ready(_ref_forward(x, params, CIN))
    np.testing.assert_allclose(np.asarray(out), np.asarray(ref), rtol=1e-4, atol=1e-4)
    assert out.shape == (N, COUT, H, W)

    print("KERNEL_OK")
</pallas_src>

<mosaic_0001>
module attributes {stable_mosaic.version = 11 : i64} {
  func.func @_ddepthwise_kernel(%arg0: i32, %arg1: memref<1x16x64xf32, #tpu.memory_space<vmem>>, %arg2: memref<3x72x128xf32, #tpu.memory_space<vmem>>, %arg3: memref<1x128xf32, #tpu.memory_space<vmem>>, %arg4: memref<3x144x128xf32, #tpu.memory_space<vmem>>, %arg5: memref<1x128xf32, #tpu.memory_space<vmem>>, %arg6: memref<1x16x128xf32, #tpu.memory_space<vmem>>, %arg7: memref<18x72xf32, #tpu.memory_space<vmem>>, %arg8: memref<18x144xf32, #tpu.memory_space<vmem>>) attributes {dimension_semantics = [#tpu.dimension_semantics<parallel>], iteration_bounds = array<i64: 2>, scalar_prefetch = 0 : i64, scratch_operands = 2 : i64, tpu.core_type = #tpu.core_type<tc>, window_params = [{transform_indices = @transform_0, window_bounds = array<i64: 1, 16, 64>}, {pipeline_mode = #tpu.pipeline_mode<synchronous>, transform_indices = @transform_1, window_bounds = array<i64: 3, 72, 128>}, {pipeline_mode = #tpu.pipeline_mode<synchronous>, transform_indices = @transform_2, window_bounds = array<i64: 1, 128>}, {pipeline_mode = #tpu.pipeline_mode<synchronous>, transform_indices = @transform_3, window_bounds = array<i64: 3, 144, 128>}, {pipeline_mode = #tpu.pipeline_mode<synchronous>, transform_indices = @transform_4, window_bounds = array<i64: 1, 128>}, {transform_indices = @transform_5, window_bounds = array<i64: 1, 16, 128>}]} {
    %cst = arith.constant 0.000000e+00 : f32
    %0 = vector.broadcast %cst : f32 to vector<18x72xf32>
    %c0 = arith.constant 0 : index
    %c0_0 = arith.constant 0 : index
    %1 = vector.load %arg7[%c0, %c0_0] : memref<18x72xf32, #tpu.memory_space<vmem>>, vector<18x72xf32>
    tpu.vector_store %arg7[%c0, %c0_0], %0 {strides = array<i32>} : memref<18x72xf32, #tpu.memory_space<vmem>>, vector<18x72xf32>,
    %c0_1 = arith.constant 0 : index
    %c0_2 = arith.constant 0 : index
    %c0_3 = arith.constant 0 : index
    %2 = vector.load %arg1[%c0_1, %c0_2, %c0_3] : memref<1x16x64xf32, #tpu.memory_space<vmem>>, vector<1x16x64xf32>
    %3 = vector.shape_cast %2 : vector<1x16x64xf32> to vector<16x64xf32>
    %c1 = arith.constant 1 : index
    %c4 = arith.constant 4 : index
    %4 = vector.load %arg7[%c1, %c4] : memref<18x72xf32, #tpu.memory_space<vmem>>, vector<16x64xf32>
    tpu.vector_store %arg7[%c1, %c4], %3 {strides = array<i32>} : memref<18x72xf32, #tpu.memory_space<vmem>>, vector<16x64xf32>,
    %cst_4 = arith.constant 0.000000e+00 : f32
    %5 = vector.broadcast %cst_4 : f32 to vector<16x128xf32>
    %c0_5 = arith.constant 0 : index
    %c0_6 = arith.constant 0 : index
    %6 = vector.load %arg7[%c0_5, %c0_6] : memref<18x72xf32, #tpu.memory_space<vmem>>, vector<16x72xf32>
    %c0_7 = arith.constant 0 : index
    %c0_8 = arith.constant 0 : index
    %c0_9 = arith.constant 0 : index
    %7 = vector.load %arg2[%c0_7, %c0_8, %c0_9] : memref<3x72x128xf32, #tpu.memory_space<vmem>>, vector<1x72x128xf32>
    %8 = vector.shape_cast %7 : vector<1x72x128xf32> to vector<72x128xf32>
    %cst_10 = arith.constant dense<0.000000e+00> : vector<16x128xf32>
    %9 = tpu.matmul %6, %8, %cst_10 {dimension_numbers = #tpu.dot_dimension_numbers<[1], [0], [0], [1], [0, 0, 1, 1], [], []>} : vector<16x72xf32>, vector<72x128xf32>, vector<16x128xf32> -> vector<16x128xf32>
    %10 = arith.addf %5, %9 : vector<16x128xf32>
    %c1_11 = arith.constant 1 : index
    %c0_12 = arith.constant 0 : index
    %11 = vector.load %arg7[%c1_11, %c0_12] : memref<18x72xf32, #tpu.memory_space<vmem>>, vector<16x72xf32>
    %c1_13 = arith.constant 1 : index
    %c0_14 = arith.constant 0 : index
    %c0_15 = arith.constant 0 : index
    %12 = vector.load %arg2[%c1_13, %c0_14, %c0_15] : memref<3x72x128xf32, #tpu.memory_space<vmem>>, vector<1x72x128xf32>
    %13 = vector.shape_cast %12 : vector<1x72x128xf32> to vector<72x128xf32>
    %cst_16 = arith.constant dense<0.000000e+00> : vector<16x128xf32>
    %14 = tpu.matmul %11, %13, %cst_16 {dimension_numbers = #tpu.dot_dimension_numbers<[1], [0], [0], [1], [0, 0, 1, 1], [], []>} : vector<16x72xf32>, vector<72x128xf32>, vector<16x128xf32> -> vector<16x128xf32>
    %15 = arith.addf %10, %14 : vector<16x128xf32>
    %c2 = arith.constant 2 : index
    %c0_17 = arith.constant 0 : index
    %16 = vector.load %arg7[%c2, %c0_17] : memref<18x72xf32, #tpu.memory_space<vmem>>, vector<16x72xf32>
    %c2_18 = arith.constant 2 : index
    %c0_19 = arith.constant 0 : index
    %c0_20 = arith.constant 0 : index
    %17 = vector.load %arg2[%c2_18, %c0_19, %c0_20] : memref<3x72x128xf32, #tpu.memory_space<vmem>>, vector<1x72x128xf32>
    %18 = vector.shape_cast %17 : vector<1x72x128xf32> to vector<72x128xf32>
    %cst_21 = arith.constant dense<0.000000e+00> : vector<16x128xf32>
    %19 = tpu.matmul %16, %18, %cst_21 {dimension_numbers = #tpu.dot_dimension_numbers<[1], [0], [0], [1], [0, 0, 1, 1], [], []>} : vector<16x72xf32>, vector<72x128xf32>, vector<16x128xf32> -> vector<16x128xf32>
    %20 = arith.addf %15, %19 : vector<16x128xf32>
    %c0_22 = arith.constant 0 : index
    %c0_23 = arith.constant 0 : index
    %21 = vector.load %arg3[%c0_22, %c0_23] : memref<1x128xf32, #tpu.memory_space<vmem>>, vector<1x128xf32>
    %22 = vector.broadcast %21 : vector<1x128xf32> to vector<16x128xf32>
    %23 = arith.addf %20, %22 : vector<16x128xf32>
    %cst_24 = arith.constant 0.000000e+00 : f32
    %24 = vector.broadcast %cst_24 : f32 to vector<16x128xf32>
    %25 = arith.maximumf %23, %24 : vector<16x128xf32>
    %cst_25 = arith.constant 0.000000e+00 : f32
    %26 = vector.broadcast %cst_25 : f32 to vector<18x144xf32>
    %c0_26 = arith.constant 0 : index
    %c0_27 = arith.constant 0 : index
    %27 = vector.load %arg8[%c0_26, %c0_27] : memref<18x144xf32, #tpu.memory_space<vmem>>, vector<18x144xf32>
    tpu.vector_store %arg8[%c0_26, %c0_27], %26 {strides = array<i32>} : memref<18x144xf32, #tpu.memory_space<vmem>>, vector<18x144xf32>,
    %c1_28 = arith.constant 1 : index
    %c8 = arith.constant 8 : index
    %28 = vector.load %arg8[%c1_28, %c8] : memref<18x144xf32, #tpu.memory_space<vmem>>, vector<16x128xf32>
    tpu.vector_store %arg8[%c1_28, %c8], %25 {strides = array<i32>} : memref<18x144xf32, #tpu.memory_space<vmem>>, vector<16x128xf32>,
    %cst_29 = arith.constant 0.000000e+00 : f32
    %29 = vector.broadcast %cst_29 : f32 to vector<16x128xf32>
    %c0_30 = arith.constant 0 : index
    %c0_31 = arith.constant 0 : index
    %30 = vector.load %arg8[%c0_30, %c0_31] : memref<18x144xf32, #tpu.memory_space<vmem>>, vector<16x144xf32>
    %c0_32 = arith.constant 0 : index
    %c0_33 = arith.constant 0 : index
    %c0_34 = arith.constant 0 : index
    %31 = vector.load %arg4[%c0_32, %c0_33, %c0_34] : memref<3x144x128xf32, #tpu.memory_space<vmem>>, vector<1x144x128xf32>
    %32 = vector.shape_cast %31 : vector<1x144x128xf32> to vector<144x128xf32>
    %cst_35 = arith.constant dense<0.000000e+00> : vector<16x128xf32>
    %33 = tpu.matmul %30, %32, %cst_35 {dimension_numbers = #tpu.dot_dimension_numbers<[1], [0], [0], [1], [0, 0, 1, 1], [], []>} : vector<16x144xf32>, vector<144x128xf32>, vector<16x128xf32> -> vector<16x128xf32>
    %34 = arith.addf %29, %33 : vector<16x128xf32>
    %c1_36 = arith.constant 1 : index
    %c0_37 = arith.constant 0 : index
    %35 = vector.load %arg8[%c1_36, %c0_37] : memref<18x144xf32, #tpu.memory_space<vmem>>, vector<16x144xf32>
    %c1_38 = arith.constant 1 : index
    %c0_39 = arith.constant 0 : index
    %c0_40 = arith.constant 0 : index
    %36 = vector.load %arg4[%c1_38, %c0_39, %c0_40] : memref<3x144x128xf32, #tpu.memory_space<vmem>>, vector<1x144x128xf32>
    %37 = vector.shape_cast %36 : vector<1x144x128xf32> to vector<144x128xf32>
    %cst_41 = arith.constant dense<0.000000e+00> : vector<16x128xf32>
    %38 = tpu.matmul %35, %37, %cst_41 {dimension_numbers = #tpu.dot_dimension_numbers<[1], [0], [0], [1], [0, 0, 1, 1], [], []>} : vector<16x144xf32>, vector<144x128xf32>, vector<16x128xf32> -> vector<16x128xf32>
    %39 = arith.addf %34, %38 : vector<16x128xf32>
    %c2_42 = arith.constant 2 : index
    %c0_43 = arith.constant 0 : index
    %40 = vector.load %arg8[%c2_42, %c0_43] : memref<18x144xf32, #tpu.memory_space<vmem>>, vector<16x144xf32>
    %c2_44 = arith.constant 2 : index
    %c0_45 = arith.constant 0 : index
    %c0_46 = arith.constant 0 : index
    %41 = vector.load %arg4[%c2_44, %c0_45, %c0_46] : memref<3x144x128xf32, #tpu.memory_space<vmem>>, vector<1x144x128xf32>
    %42 = vector.shape_cast %41 : vector<1x144x128xf32> to vector<144x128xf32>
    %cst_47 = arith.constant dense<0.000000e+00> : vector<16x128xf32>
    %43 = tpu.matmul %40, %42, %cst_47 {dimension_numbers = #tpu.dot_dimension_numbers<[1], [0], [0], [1], [0, 0, 1, 1], [], []>} : vector<16x144xf32>, vector<144x128xf32>, vector<16x128xf32> -> vector<16x128xf32>
    %44 = arith.addf %39, %43 : vector<16x128xf32>
    %c0_48 = arith.constant 0 : index
    %c0_49 = arith.constant 0 : index
    %45 = vector.load %arg5[%c0_48, %c0_49] : memref<1x128xf32, #tpu.memory_space<vmem>>, vector<1x128xf32>
    %46 = vector.broadcast %45 : vector<1x128xf32> to vector<16x128xf32>
    %47 = arith.addf %44, %46 : vector<16x128xf32>
    %cst_50 = arith.constant 0.000000e+00 : f32
    %48 = vector.broadcast %cst_50 : f32 to vector<16x128xf32>
    %49 = arith.maximumf %47, %48 : vector<16x128xf32>
    %c0_51 = arith.constant 0 : index
    %c0_52 = arith.constant 0 : index
    %c0_53 = arith.constant 0 : index
    %50 = vector.load %arg6[%c0_51, %c0_52, %c0_53] : memref<1x16x128xf32, #tpu.memory_space<vmem>>, vector<1x16x128xf32>
    %51 = vector.shape_cast %50 : vector<1x16x128xf32> to vector<16x128xf32>
    %52 = vector.shape_cast %49 : vector<16x128xf32> to vector<1x16x128xf32>
    tpu.vector_store %arg6[%c0_51, %c0_52, %c0_53], %52 {strides = array<i32>} : memref<1x16x128xf32, #tpu.memory_space<vmem>>, vector<1x16x128xf32>,
    return
  }
  func.func @transform_0(%arg0: i32) -> (i32, i32, i32) {
    %c0_i32 = arith.constant 0 : i32
    %c0_i32_0 = arith.constant 0 : i32
    %c0_i32_1 = arith.constant 0 : i32
    return %arg0, %c0_i32, %c0_i32_0 : i32, i32, i32
  }
  func.func @transform_1(%arg0: i32) -> (i32, i32, i32) {
    %c0_i32 = arith.constant 0 : i32
    %c0_i32_0 = arith.constant 0 : i32
    %c0_i32_1 = arith.constant 0 : i32
    %c0_i32_2 = arith.constant 0 : i32
    return %c0_i32, %c0_i32_0, %c0_i32_1 : i32, i32, i32
  }
  func.func @transform_2(%arg0: i32) -> (i32, i32) {
    %c0_i32 = arith.constant 0 : i32
    %c0_i32_0 = arith.constant 0 : i32
    %c0_i32_1 = arith.constant 0 : i32
    return %c0_i32, %c0_i32_0 : i32, i32
  }
  func.func @transform_3(%arg0: i32) -> (i32, i32, i32) {
    %c0_i32 = arith.constant 0 : i32
    %c0_i32_0 = arith.constant 0 : i32
    %c0_i32_1 = arith.constant 0 : i32
    %c0_i32_2 = arith.constant 0 : i32
    return %c0_i32, %c0_i32_0, %c0_i32_1 : i32, i32, i32
  }
  func.func @transform_4(%arg0: i32) -> (i32, i32) {
    %c0_i32 = arith.constant 0 : i32
    %c0_i32_0 = arith.constant 0 : i32
    %c0_i32_1 = arith.constant 0 : i32
    return %c0_i32, %c0_i32_0 : i32, i32
  }
  func.func @transform_5(%arg0: i32) -> (i32, i32, i32) {
    %c0_i32 = arith.constant 0 : i32
    %c0_i32_0 = arith.constant 0 : i32
    %c0_i32_1 = arith.constant 0 : i32
    return %arg0, %c0_i32, %c0_i32_0 : i32, i32, i32
  }
}

</mosaic_0001>

<bundles_post_ra>
// kernel: tpu_custom_call.1
= control target key start
LH: loop header
LB: loop body
LE: loop exit
PB: predicated region body
PF: predicated region fallthrough
CT: control target
= control target key end

     0   :  { %10 = vsyncpa [#allocation5], 0  ;;  %s1358_s0 = inlined_call_operand.hbm [shape: f32[2,16,64], index: 0, kind: input, shape index: {}]   ;;  %s1359_s1 = inlined_call_operand.hbm [shape: f32[3,72,128], index: 1, kind: input, shape index: {}]   ;;  %s1360_s2 = inlined_call_operand.vmem [shape: f32[1,128], index: 2, kind: input, shape index: {}]   ;;  %s1361_s3 = inlined_call_operand.hbm [shape: f32[3,144,128], index: 3, kind: input, shape index: {}]   ;;  %s1362_s4 = inlined_call_operand.vmem [shape: f32[1,128], index: 4, kind: input, shape index: {}]   ;;  %s1363_s5 = inlined_call_operand.hbm [shape: f32[2,16,128], index: 5, kind: output, shape index: {}]  }
   0x1   :  { %12 = vsyncpa [#allocation5 + $0x1], 0 }
   0x2   :  { %13 = vsyncpa [#allocation8], 0 }
   0x3   :  { %14 = vsyncpa [#allocation6], 0 }
   0x4   :  { %16 = vsyncpa [#allocation6 + $0x1], 0  ;;  %s1161_s18 = smov 0   ;;  %s1163_s19 = smov 0  }
   0x5   :  { %s1165_s20 = smov 0   ;;  %s1167_s21 = smov 0  }
   0x6 LB: > { %s1182_s22 = sadd.s32 4294967295, %s1121_s21   ;;  %s838_s23 = sadd.s32 4294967294, %s1121_s21   ;;  %s1121_s21 = sphi %s1167_s21, %s1375_s21   ;;  %s1117_s20 = sphi %s1165_s20, %s1374_s20   ;;  %s1113_s19 = sphi %s1163_s19, %s1373_s19   ;;  %s1109_s18 = sphi %s1161_s18, %s1372_s18  }
   0x7   : > { %p42_p0 = scmp.ne.s32.totalorder %s1113_s19, %s1109_s18  ;;  %p43_p1 = scmp.eq.s32.totalorder %s1182_s22, 0 }
   0x8   : > { %p150_p2 = scmp.eq.s32.totalorder %s1182_s22, 1  ;;  %p156_p3 = scmp.eq.s32.totalorder %s838_s23, 1 }
   0x9   : > { %p1191_p4 = por %p43_p1, %p42_p0  ;;  %p839_p5 = scmp.ge.s32.totalorder %s1121_s21, 1 }
   0xa   : > { %p1196_p6 = por %p156_p3, %p42_p0  ;;  %p163_p7 = scmp.lt.s32.totalorder %s1121_s21, 3 }
   0xb   : > { %s174_s28 = sshll.u32 %s1359_s1, 4  ;;  %s1123_s30 = smov [#allocation7]   ;;  %s175_s28 = int_to_ptr.hbm [resolvable:$true] %s174_s28 }
   0xc   : > { %p1204_p8 = pnand %p839_p5, %p163_p7  ;;  %s176_s6 = sshll.u32 %s1123_s30, 4  ;;  %s177_s6 = int_to_ptr.vmem [resolvable:$true] %s176_s6 }
   0xd   : > { %s191_s9 = sshll.u32 %s1361_s3, 4  ;;  %s1364_s10 = smov 128   ;;  %s192_s9 = int_to_ptr.hbm [resolvable:$true] %s191_s9 }
   0xe   : > { %p898_p9 = pneg %p1204_p8  ;;  %s1125_s11 = smov 8  }
   0xf   : > { %s1126_s12 = smov [#allocation9]   ;;  %s1223_s14 = sadd.s32 1, %s1121_s21  }
  0x10   : > { %p899_p10 = pnand %p898_p9, %p43_p1  ;;  %s193_s13 = sshll.u32 %s1126_s12, 4  ;;  %s194_s13 = int_to_ptr.vmem [resolvable:$true] %s193_s13 }
  0x11   : > { %s29_s15 = sadd.s32 1, %s1117_s20  ;;  %s26_s16 = ssub.s32 %s1121_s21, %s1223_s14 }
  0x12   : > { %901 = dma.hbm_to_vmem [thread:$0]  (!%p899_p10), %s175_s28, 3456, %s177_s6, [#allocation8], %s1364_s10, %s1364_s10, %s1125_s11  }
  0x13   : > { %904 = dma.hbm_to_vmem [thread:$0]  (!%p899_p10), %s192_s9, 6912, %s194_s13, [#allocation8], %s1364_s10, %s1364_s10, %s1125_s11  }
  0x14   : > { %p36_p12 = scmp.ne.s32.totalorder %s1117_s20, %s1113_s19  ;;  %p27_p13 = scmp.eq.s32.totalorder %s26_s16, 0 }
  0x15   : > { %p37_p0 = scmp.eq.s32.totalorder %s1121_s21, 0  ;;  %p915_p5 = scmp.lt.s32.totalorder %s1121_s21, 2 }
  0x16   : > { %p1233_p3 = por %p150_p2, %p36_p12  ;;  %s210_s26 = sand.u32 1, %s1117_s20  }
  0x17   : > { %s1239_s23 = scalar_select %p27_p13, %s1117_s20, %s29_s15  }
  0x18   : > { %p38_p7 = por %p37_p0, %p36_p12  ;;  %s843_s27 = sshll.u32 %s210_s26, 4 }
  0x19   : > { %s868_s28 = sshll.u32 %s1121_s21, 4  ;;  %s214_s8 = scalar_lea.vmem [#allocation4], %s843_s27 }
  0x1a   : > { %s219_s7 = scalar_lea.hbm %s1358_s0, %s868_s28  ;;  %s222_s9 = sshll.u32 %s214_s8, 4  ;;  %s223_s9 = int_to_ptr.vmem [resolvable:$true] %s222_s9 }
  0x1b   : > { %s220_s12 = sshll.u32 %s219_s7, 4  ;;  %p1246_p2 = pnand %p915_p5, %p38_p7  ;;  %s221_s12 = int_to_ptr.hbm [resolvable:$true] %s220_s12 }
  0x1c   : > { %s211_s15 = scalar_lea.sflag [#allocation5], %s210_s26  ;;  %s1021_s16 = sshra.s32 %s221_s12, 4  ;;  %s1022_s16 = int_to_ptr.hbm [resolvable:$true] %s1021_s16 }
  0x1d   : > { %s1023_s10 = scalar_lea.hbm %s1022_s16, 16  ;;  %p1025_p10 = pneg %p1246_p2 }
  0x1e   : > { %p1024_p9 = scmp.ne.s32.totalorder %s1022_s16, %s1023_s10  ;;  %s1028_s30 = scalar_lea.hbm %s1358_s0, 32 }
  0x1f   : > { %p1029_p0 = scmp.lt.s32.totalorder %s1022_s16, %s1358_s0  ;;  %p1030_p5 = scmp.lt.s32.totalorder %s1028_s30, %s1023_s10 }
  0x20   : > { %p1026_p12 = pnand %p1025_p10, %p1024_p9 }
  0x21   : > { %p1031_p7 = por %p1030_p5, %p1029_p0 }
  0x22   : > { %p1027_p13 = pneg %p1026_p12 }
  0x24   : > { %p1032_p11 = pnand %p1031_p7, %p1027_p13 }
  0x26   : > { %1035 = shalt.err (!%p1032_p11)
}
  0x27   : > { %s1370_s26 = smov 128   ;;  %234 = sbr.rel (%p1204_p8) target bundleno = 620 (0x26c), region = 40 }
  0x28   : > { %908 = dma.hbm_to_vmem [thread:$0]  (!%p1246_p2), %s221_s12, 256, %s223_s9, %s211_s15, %s1370_s26, %s1370_s26, %s1125_s11  }
  0x29   : > { %s1266_s8 = sand.u32 (!%p1204_p8), 1, %s1113_s19  }
  0x2a   : > { %s847_s10 = sshll.u32 (!%p1204_p8), %s1266_s8, 4  ;;  %s237_s16 = scalar_lea.sflag (!%p1204_p8), [#allocation5], %s1266_s8 }
  0x2b   : > { %s240_s28 = scalar_lea.vmem (!%p1204_p8), [#allocation4], %s847_s10 }
  0x2c   : > { %1096 = dma.done.wait (%p1191_p4), %s237_s16, 256  }
  0x2d   : > { %1098 = vsyncadd (%p1191_p4), %s237_s16, 4294967040 }
  0x2e   : > { %1100 = dma.done.wait (%p43_p1), [#allocation8], 10368  }
  0x2f   : > { %1102 = vsyncadd (%p43_p1), [#allocation8], 4294956928  ;;  %vm278_vm0 = vcmask 588800   ;;  %v1127_v0 = vmov 0.0   ;;  %v283_v1 = vld [vmem:[%s240_s28] sm:$0xff]  ;;  %v318_v2 = vld [vmem:[#allocation7 + $0x88] sm:$0xff] }
  0x30   : > { %279 = vst.msk [vmem:[#allocation2] sm:$0xff] %vm278_vm0, %v1127_v0  ;;  %s1128_s24 = smov 4   ;;  %332 = vmatpush.msra.mxu0 %v318_v2  ;;  %v306_v3 = vld [vmem:[#allocation7 + $0x40] sm:$0xff]  ;;  %v305_v5 = vld [vmem:[#allocation7 + $0x38] sm:$0xff]  ;;  %v304_v7 = vld [vmem:[#allocation7 + $0x30] sm:$0xff]  ;;  %vm281_vm1 = vcmask 582656  }
  0x31   : > { %280 = vst.msk [vmem:[#allocation2 + $0x8] sm:$0xff] %vm278_vm0, %v1127_v0  ;;  %287 = vrot.lane.b32.xlu0 %v283_v1, %s1128_s24  ;;  %v317_v4 = vld [vmem:[#allocation7 + $0x80] sm:$0xff]  ;;  %361 = vmatpush.msra.mxu1 %v306_v3  ;;  %v316_v6 = vld [vmem:[#allocation7 + $0x78] sm:$0xff]  ;;  %v315_v8 = vld [vmem:[#allocation7 + $0x70] sm:$0xff]  ;;  %vm293_vm2 = vcmask 556064   ;;  %vm434_vm3 = vcmask 123904  }
  0x32   : > { %428 = vst [vmem:[#allocation3] sm:$0xff] %v1127_v0  ;;  %333 = vmatpush.msra.mxu0 %v317_v4  ;;  %v388_v9 = vld [vmem:[#allocation7 + $0xd0] sm:$0xff]  ;;  %v303_v10 = vld [vmem:[#allocation7 + $0x28] sm:$0xff]  ;;  %v302_v13 = vld [vmem:[#allocation7 + $0x20] sm:$0xff]  ;;  %s1129_s9 = smov 8   ;;  %vm438_vm4 = vcmask 1040384  }
  0x33   : > { %431 = vst [vmem:[#allocation3 + $0x10] sm:$0xff] %v1127_v0  ;;  %362 = vmatpush.msra.mxu1 %v305_v5  ;;  %402 = vmatpush.msra.mxu2 %v388_v9  ;;  %v284_v11 = vld [vmem:[%s240_s28 + $0x8] sm:$0xff]  ;;  %v313_v14 = vld [vmem:[#allocation7 + $0x60] sm:$0xff]  ;;  %v300_v18 = vld [vmem:[#allocation7 + $0x10] sm:$0xff]  ;;  %vm429_vm5 = vcmask 130048   ;;  %vm459_vm6 = vcmask 1040448  }
  0x34   : > { %433 = vst [vmem:[#allocation3 + $0x20] sm:$0x3] %v1127_v0  ;;  %334 = vmatpush.msra.mxu0 %v316_v6  ;;  %v314_v12 = vld [vmem:[#allocation7 + $0x68] sm:$0xff]  ;;  %v301_v15 = vld [vmem:[#allocation7 + $0x18] sm:$0xff]  ;;  %v386_v19 = vld [vmem:[#allocation7 + $0xc0] sm:$0xff]  ;;  %vm461_vm7 = vcmask 57344  }
  0x35   : > { %363 = vmatpush.msra.mxu1 %v304_v7  ;;  %v387_v16 = vld [vmem:[#allocation7 + $0xc8] sm:$0xff]  ;;  %v312_v17 = vld [vmem:[#allocation7 + $0x58] sm:$0xff]  ;;  %282 = vst.msk [vmem:[#allocation2 + $0x10] sm:$0x3] %vm281_vm1, %v1127_v0  ;;  %v311_v20 = vld [vmem:[#allocation7 + $0x50] sm:$0xff]  ;;  %vm451_vm8 = vcmask 1047617  }
  0x36   : > { %335 = vmatpush.msra.mxu0 %v315_v8  ;;  %403 = vmatpush.msra.mxu2 %v387_v16  ;;  %v299_v21 = vld [vmem:[#allocation7 + $0x8] sm:$0xff]  ;;  %v385_v22 = vld [vmem:[#allocation7 + $0xb8] sm:$0xff]  ;;  %v298_v24 = vld [vmem:[#allocation7] sm:$0xff]  ;;  %435 = vst.msk [vmem:[#allocation3 + $0x28] sm:$0x3] %vm434_vm3, %v1127_v0  ;;  %vm453_vm9 = vcmask 64513  }
  0x37   : > { %364 = vmatpush.msra.mxu1 %v303_v10  ;;  %v310_v23 = vld [vmem:[#allocation7 + $0x48] sm:$0xff]  ;;  %v384_v25 = vld [vmem:[#allocation7 + $0xb0] sm:$0xff]  ;;  %v382_v27 = vld [vmem:[#allocation7 + $0xa0] sm:$0xff]  ;;  %430 = vst.msk [vmem:[#allocation3 + $0x8] sm:$0xff] %vm429_vm5, %v1127_v0  ;;  %vm455_vm10 = vcmask 1047616   ;;  %vm457_vm11 = vcmask 64512  }
  0x38   : > { %336 = vmatpush.msra.mxu0 %v314_v12  ;;  %404 = vmatpush.msra.mxu2 %v386_v19  ;;  %v383_v26 = vld [vmem:[#allocation7 + $0xa8] sm:$0xff]  ;;  %v381_v28 = vld [vmem:[#allocation7 + $0x98] sm:$0xff]  ;;  %v380_v29 = vld [vmem:[#allocation7 + $0x90] sm:$0xff]  ;;  %432 = vst.msk [vmem:[#allocation3 + $0x18] sm:$0xff] %vm429_vm5, %v1127_v0  ;;  %vm514_vm12 = vcmask 1046528   ;;  %vm655_vm13 = vcmask 1045504  }
  0x39   : > { %289 = vrot.lane.b32.xlu0 %v284_v11, %s1128_s24  ;;  %365 = vmatpush.msra.mxu1 %v302_v13  ;;  %v505_v38 = vld [vmem:[#allocation9 + $0x108] sm:$0xff]  ;;  %v504_v39 = vld [vmem:[#allocation9 + $0x100] sm:$0xff]  ;;  %v482_v40 = vld [vmem:[#allocation9 + $0x78] sm:$0xff]  ;;  %s869_s15 = sshll.u32 %s1182_s22, 4  ;;  %s277_s27 = scalar_lea.vmem [#allocation10], %s847_s10 }
  0x3a   : > { %337 = vmatpush.msra.mxu0 %v313_v14  ;;  %405 = vmatpush.msra.mxu2 %v385_v22  ;;  %v481_v41 = vld [vmem:[#allocation9 + $0x70] sm:$0xff]  ;;  %v503_v42 = vld [vmem:[#allocation9 + $0xf8] sm:$0xff]  ;;  %v480_v43 = vld [vmem:[#allocation9 + $0x68] sm:$0xff]  ;;  %s742_s7 = scalar_lea.hbm %s1363_s5, %s869_s15  ;;  %s743_s26 = sshll.u32 %s277_s27, 4  ;;  %s744_s26 = int_to_ptr.vmem [resolvable:$true] %s743_s26 }
  0x3b   : > { %366 = vmatpush.msra.mxu1 %v301_v15  ;;  %531 = vmatpush.msra.mxu3 %v505_v38  ;;  %v502_v44 = vld [vmem:[#allocation9 + $0xf0] sm:$0xff]  ;;  %v479_v45 = vld [vmem:[#allocation9 + $0x60] sm:$0xff]  ;;  %v501_v46 = vld [vmem:[#allocation9 + $0xe8] sm:$0xff]  ;;  %s745_s16 = sshll.u32 %s742_s7, 4  ;;  %s731_s22 = scalar_lea.sflag [#allocation6], %s1266_s8  ;;  %s746_s16 = int_to_ptr.hbm [resolvable:$true] %s745_s16 }
  0x3c   : > { %338 = vmatpush.msra.mxu0 %v312_v17  ;;  %406 = vmatpush.msra.mxu2 %v384_v25  ;;  %v959_v50 = vld [vmem:[%s1360_s2] ss:$0 sm:$0xff]  ;;  %v478_v3 = vld [vmem:[#allocation9 + $0x58] sm:$0xff]  ;;  %v477_v5 = vld [vmem:[#allocation9 + $0x50] sm:$0xff]  ;;  %s1065_s28 = sshra.s32 %s746_s16, 4  ;;  %s1071_s11 = scalar_lea.hbm %s1363_s5, 32  ;;  %s1066_s28 = int_to_ptr.hbm [resolvable:$true] %s1065_s28 }
  0x3d   : > { %367 = vmatpush.msra.mxu1 %v300_v18  ;;  %532 = vmatpush.msra.mxu3 %v504_v39  ;;  %v500_v2 = vld [vmem:[#allocation9 + $0xe0] sm:$0xff]  ;;  %v499_v4 = vld [vmem:[#allocation9 + $0xd8] sm:$0xff]  ;;  %v498_v6 = vld [vmem:[#allocation9 + $0xd0] sm:$0xff]  ;;  %s1067_s10 = scalar_lea.hbm %s1066_s28, 16  ;;  %p1072_p11 = scmp.lt.s32.totalorder %s1066_s28, %s1363_s5 }
  0x3e   : > { %339 = vmatpush.msra.mxu0 %v311_v20  ;;  %407 = vmatpush.msra.mxu2 %v383_v26  ;;  %v476_v7 = vld [vmem:[#allocation9 + $0x48] sm:$0xff]  ;;  %v483_v10 = vld [vmem:[#allocation9 + $0x80] sm:$0xff]  ;;  %v648_v12 = vld [vmem:[#allocation9 + $0x198] sm:$0xff]  ;;  %p1068_p1 = scmp.ne.s32.totalorder %s1066_s28, %s1067_s10  ;;  %p1073_p2 = scmp.lt.s32.totalorder %s1071_s11, %s1067_s10 }
  0x3f   : > { %368 = vmatpush.msra.mxu1 %v299_v21  ;;  %533 = vmatpush.msra.mxu3 %v503_v42  ;;  %v484_v8 = vld [vmem:[#allocation9 + $0x88] sm:$0xff]  ;;  %v475_v11 = vld [vmem:[#allocation9 + $0x40] sm:$0xff]  ;;  %v647_v14 = vld [vmem:[#allocation9 + $0x190] sm:$0xff] }
  0x40   : > { %340 = vmatpush.msra.mxu0 %v310_v23  ;;  %408 = vmatpush.msra.mxu2 %v382_v27  ;;  %v497_v9 = vld [vmem:[#allocation9 + $0xc8] sm:$0xff]  ;;  %v496_v13 = vld [vmem:[#allocation9 + $0xc0] sm:$0xff]  ;;  %v474_v15 = vld [vmem:[#allocation9 + $0x38] sm:$0xff]  ;;  %p1069_p4 = pnand %p1068_p1, %p1233_p3  ;;  %p1074_p9 = por %p1073_p2, %p1072_p11 }
  0x41   : > { %369 = vmatpush.msra.mxu1 %v298_v24  ;;  %534 = vmatpush.msra.mxu3 %v502_v44  ;;  %v495_v16 = vld [vmem:[#allocation9 + $0xb8] sm:$0xff]  ;;  %v646_v17 = vld [vmem:[#allocation9 + $0x188] sm:$0xff]  ;;  %v473_v18 = vld [vmem:[#allocation9 + $0x30] sm:$0xff] }
  0x42   : > { %409 = vmatpush.msra.mxu2 %v381_v28  ;;  %v494_v0 = vld [vmem:[#allocation9 + $0xb0] sm:$0xff]  ;;  %v472_v19 = vld [vmem:[#allocation9 + $0x28] sm:$0xff]  ;;  %v471_v21 = vld [vmem:[#allocation9 + $0x20] sm:$0xff]  ;;  %p1070_p8 = pneg %p1069_p4 }
  0x43   : > { %582 = vmatpush.msrb.mxu1 %v482_v40  ;;  %535 = vmatpush.msra.mxu3 %v501_v46  ;;  %v493_v20 = vld [vmem:[#allocation9 + $0xa8] sm:$0xff]  ;;  %v492_v22 = vld [vmem:[#allocation9 + $0xa0] sm:$0xff]  ;;  %v470_v24 = vld [vmem:[#allocation9 + $0x18] sm:$0xff] }
  0x44   : > { %410 = vmatpush.msra.mxu2 %v380_v29  ;;  %v645_v23 = vld [vmem:[#allocation9 + $0x180] sm:$0xff]  ;;  %v491_v25 = vld [vmem:[#allocation9 + $0x98] sm:$0xff]  ;;  %v469_v27 = vld [vmem:[#allocation9 + $0x10] sm:$0xff]  ;;  %p1075_p10 = pnand %p1074_p9, %p1070_p8 }
  0x45   : > { %583 = vmatpush.msrb.mxu1 %v481_v41  ;;  %536 = vmatpush.msra.mxu3 %v500_v2  ;;  %v644_v26 = vld [vmem:[#allocation9 + $0x178] sm:$0xff]  ;;  %v490_v28 = vld [vmem:[#allocation9 + $0x90] sm:$0xff]  ;;  %v638_v38 = vld [vmem:[#allocation9 + $0x148] sm:$0xff] }
  0x46   : > { %619 = vmatpush.msrb.mxu2 %v484_v8  ;;  %v507_v29 = vld [vmem:[#allocation9 + $0x118] sm:$0xff]  ;;  %v637_v39 = vld [vmem:[#allocation9 + $0x140] sm:$0xff]  ;;  %v635_v42 = vld [vmem:[#allocation9 + $0x130] sm:$0xff] }
  0x47   : > { %584 = vmatpush.msrb.mxu1 %v480_v43  ;;  %537 = vmatpush.msra.mxu3 %v499_v4  ;;  %v636_v41 = vld [vmem:[#allocation9 + $0x138] sm:$0xff]  ;;  %v650_v43 = vld [vmem:[#allocation9 + $0x1a8] sm:$0xff]  ;;  %v649_v46 = vld [vmem:[#allocation9 + $0x1a0] sm:$0xff] }
  0x48   : > { %620 = vmatpush.msrb.mxu2 %v483_v10  ;;  %568 = vmatpush.msrb.mxu0 %v507_v29  ;;  %v634_v44 = vld [vmem:[#allocation9 + $0x128] sm:$0xff] }
  0x49   : > { %585 = vmatpush.msrb.mxu1 %v479_v45  ;;  %538 = vmatpush.msra.mxu3 %v498_v6  ;;  %v633_v45 = vld [vmem:[#allocation9 + $0x120] sm:$0xff] }
  0x4b   : > { %586 = vmatpush.msrb.mxu1 %v478_v3  ;;  %539 = vmatpush.msra.mxu3 %v497_v9 }
  0x4d   : > { %587 = vmatpush.msrb.mxu1 %v477_v5  ;;  %540 = vmatpush.msra.mxu3 %v496_v13 }
  0x4f   : > { %588 = vmatpush.msrb.mxu1 %v476_v7  ;;  %541 = vmatpush.msra.mxu3 %v495_v16 }
  0x51   : > { %589 = vmatpush.msrb.mxu1 %v475_v11  ;;  %542 = vmatpush.msra.mxu3 %v494_v0 }
  0x53   : > { %590 = vmatpush.msrb.mxu1 %v474_v15  ;;  %543 = vmatpush.msra.mxu3 %v493_v20 }
  0x55   : > { %591 = vmatpush.msrb.mxu1 %v473_v18  ;;  %544 = vmatpush.msra.mxu3 %v492_v22 }
  0x57   : > { %592 = vmatpush.msrb.mxu1 %v472_v19  ;;  %545 = vmatpush.msra.mxu3 %v491_v25 }
  0x59   : > { %593 = vmatpush.msrb.mxu1 %v471_v21  ;;  %546 = vmatpush.msra.mxu3 %v490_v28 }
  0x5b   : > { %594 = vmatpush.msrb.mxu1 %v470_v24  ;;  %870 = vmatpush.msrb.mxu3 %v648_v12 }
  0x5d   : > { %595 = vmatpush.msrb.mxu1 %v469_v27  ;;  %871 = vmatpush.msrb.mxu3 %v647_v14 }
  0x5f   : > { %872 = vmatpush.msrb.mxu3 %v646_v17 }
  0x61   : > { %873 = vmatpush.msrb.mxu3 %v645_v23 }
  0x63   : > { %874 = vmatpush.msrb.mxu3 %v644_v26 }
  0xa3   : > { %v288_v30 = vpop.permute.xlu0 %287 }
  0xa4   : > { %294 = vst.msk [vmem:[#allocation2 + $0x1] sm:$0xff] %vm293_vm2, %v288_v30  ;;  %v643_v30 = vld [vmem:[#allocation9 + $0x170] sm:$0xff] }
  0xa5   : > { %875 = vmatpush.msrb.mxu3 %v643_v30 }
  0xab   : > { %v290_v31 = vpop.permute.xlu0 %289  ;;  %v307_v32 = vld [vmem:[#allocation2 + $0x1] sm:$0xff] }
  0xac   : > { %v296_v33 = vld [vmem:[#allocation2] sm:$0xff]  ;;  %295 = vst.msk [vmem:[#allocation2 + $0x9] sm:$0xff] %vm293_vm2, %v290_v31  ;;  %851 = vmatmul.msk.f32.vlgmr.msra.gmra.mxu0 %vm278_vm0, %v307_v32  ;;  %v468_v31 = vld [vmem:[#allocation9 + $0x8] sm:$0xff] }
  0xad   : > { %853 = vmatmul.msk.f32.vlgmr.msra.gmra.mxu1 %vm278_vm0, %v296_v33  ;;  %v642_v32 = vld [vmem:[#allocation9 + $0x168] sm:$0xff]  ;;  %v467_v33 = vld [vmem:[#allocation9] sm:$0xff] }
  0xae   : > { %596 = vmatpush.msrb.mxu1 %v468_v31  ;;  %876 = vmatpush.msrb.mxu3 %v642_v32  ;;  %v960_v31 = vld [vmem:[%s1362_s4] ss:$0 sm:$0xff] }
  0xb0   : > { %597 = vmatpush.msrb.mxu1 %v467_v33 }
  0xb3   : > { %v308_v34 = vld [vmem:[#allocation2 + $0x9] sm:$0xff] }
  0xb4   : > { %v297_v35 = vld [vmem:[#allocation2 + $0x8] sm:$0xff]  ;;  %852 = vmatmul.msk.f32.gmra.mxu0 %vm278_vm0, %v308_v34  ;;  %v641_v34 = vld [vmem:[#allocation9 + $0x160] sm:$0xff] }
  0xb5   : > { %v377_v36 = vld [vmem:[#allocation2 + $0x2] sm:$0xff]  ;;  %854 = vmatmul.msk.f32.gmra.mxu1 %vm278_vm0, %v297_v35  ;;  %v378_v37 = vld [vmem:[#allocation2 + $0xa] sm:$0xff]  ;;  %v640_v35 = vld [vmem:[#allocation9 + $0x158] sm:$0xff]  ;;  %877 = vmatpush.msrb.mxu3 %v641_v34 }
  0xb6   : > { %855 = vmatmul.msk.f32.vlgmr.msra.gmra.mxu2 %vm278_vm0, %v377_v36  ;;  %v506_v36 = vld [vmem:[#allocation9 + $0x110] sm:$0xff] }
  0xb7   : > { %672 = vmatpush.msra.mxu2 %v648_v12  ;;  %569 = vmatpush.msrb.mxu0 %v506_v36 }
  0xb8   : > { %878 = vmatpush.msrb.mxu3 %v640_v35 }
  0xb9   : > { %673 = vmatpush.msra.mxu2 %v647_v14  ;;  %709 = vmatpush.msra.mxu0 %v650_v43 }
  0xbb   : > { %674 = vmatpush.msra.mxu2 %v646_v17  ;;  %710 = vmatpush.msra.mxu0 %v649_v46 }
  0xbd   : > { %675 = vmatpush.msra.mxu2 %v645_v23 }
  0xbe   : > { %856 = vmatmul.msk.f32.gmra.mxu2 %vm278_vm0, %v378_v37  ;;  %v639_v37 = vld [vmem:[#allocation9 + $0x150] sm:$0xff] }
  0xbf   : > { %676 = vmatpush.msra.mxu2 %v644_v26  ;;  %879 = vmatpush.msrb.mxu3 %v639_v37 }
  0xc1   : > { %677 = vmatpush.msra.mxu2 %v643_v30  ;;  %880 = vmatpush.msrb.mxu3 %v638_v38 }
  0xc3   : > { %678 = vmatpush.msra.mxu2 %v642_v32  ;;  %881 = vmatpush.msrb.mxu3 %v637_v39 }
  0xc5   : > { %679 = vmatpush.msra.mxu2 %v641_v34  ;;  %882 = vmatpush.msrb.mxu3 %v636_v41 }
  0xc7   : > { %680 = vmatpush.msra.mxu2 %v640_v35  ;;  %883 = vmatpush.msrb.mxu3 %v635_v42 }
  0xc9   : > { %681 = vmatpush.msra.mxu2 %v639_v37  ;;  %884 = vmatpush.msrb.mxu3 %v634_v44 }
  0xcb   : > { %682 = vmatpush.msra.mxu2 %v638_v38  ;;  %885 = vmatpush.msrb.mxu3 %v633_v45 }
  0xcd   : > { %683 = vmatpush.msra.mxu2 %v637_v39 }
  0xcf   : > { %684 = vmatpush.msra.mxu2 %v636_v41 }
  0xd1   : > { %685 = vmatpush.msra.mxu2 %v635_v42 }
  0xd3   : > { %686 = vmatpush.msra.mxu2 %v634_v44 }
  0xd5   : > { %687 = vmatpush.msra.mxu2 %v633_v45 }
 0x129   : > { %v342_v47 = vpop.f32.mrf.mxu0 }
 0x12a   : > { %v371_v48 = vpop.f32.mrf.mxu1 }
 0x12b   : > { %v372_v49 = vadd.f32 %v371_v48, %v342_v47 }
 0x131   : > { %v345_v54 = vpop.f32.mrf.mxu0 }
 0x132   : > { %v374_v55 = vpop.f32.mrf.mxu1 }
 0x133   : > { %v375_v57 = vadd.f32 %v374_v55, %v345_v54 }
 0x139   : > { %v412_v51 = vpop.f32.mrf.mxu2 }
 0x13a   : > { %v418_v52 = vadd.f32 %v412_v51, %v372_v49 }
 0x13c   : > { %v424_v53 = vadd.f32 %v959_v50, %v418_v52 }
 0x13e   : > { %v426_v56 = vmax.f32 %v424_v53, 0.0 }
 0x140   : > { %v439_v58 = vrot.slane %v426_v56, 7 }
 0x141   : > { %v415_v59 = vpop.f32.mrf.mxu2 }
 0x142   : > { %v419_v60 = vadd.f32 %v415_v59, %v375_v57  ;;  %442 = vrot.lane.b32.xlu1 %v439_v58, %s1129_s9 }
 0x144   : > { %v425_v61 = vadd.f32 %v959_v50, %v419_v60 }
 0x146   : > { %v427_v62 = vmax.f32 %v425_v61, 0.0 }
 0x148   : > { %v440_v63 = vrot.slane %v427_v62, 7 }
 0x14a   : > { %446 = vrot.lane.b32.xlu2 %v440_v63, %s1129_s9  ;;  %v441_v1 = vsel %vm438_vm4, %v439_v58, %v440_v63 }
 0x14b   : > { %444 = vrot.lane.b32.xlu1 %v441_v1, %s1129_s9 }
 0x1a4   : > { %v447_v40 = vpop.permute.xlu2 %446 }
 0x1a5   : > { %460 = vst.msk [vmem:[#allocation3 + $0x20] sm:$0x1] %vm459_vm6, %v447_v40 }
 0x1a6   : > { %462 = vst.msk [vmem:[#allocation3 + $0x28] sm:$0x1] %vm461_vm7, %v447_v40 }
 0x1ac   : > { %v487_v63 = vld [vmem:[#allocation3 + $0x20] sm:$0x1] }
 0x1ad   : > { %v488_v2 = vld [vmem:[#allocation3 + $0x28] sm:$0x1]  ;;  %v521_v4 = vrot.slane %v487_v63, 1  ;;  %v630_v8 = vld [vmem:[#allocation3 + $0x20] sm:$0x3] }
 0x1ae   : > { %v523_v5 = vrot.slane %v488_v2, 1  ;;  %v662_v11 = vrot.slane %v630_v8, 2  ;;  %v631_v15 = vld [vmem:[#allocation3 + $0x28] sm:$0x3] }
 0x1af   : > { %v664_v16 = vrot.slane %v631_v15, 2 }
 0x1b4   : > { %v443_v47 = vpop.permute.xlu1 %442 }
 0x1b5   : > { %452 = vst.msk [vmem:[#allocation3] sm:$0xfe] %vm451_vm8, %v443_v47 }
 0x1b6   : > { %454 = vst.msk [vmem:[#allocation3 + $0x8] sm:$0xfe] %vm453_vm9, %v443_v47 }
 0x1bc   : > { %v463_v48 = vld [vmem:[#allocation3] sm:$0xff] }
 0x1bd   : > { %598 = vmatmul.f32.vlgmr.msrb.gmra.mxu1 %v463_v48  ;;  %v464_v49 = vld [vmem:[#allocation3 + $0x8] sm:$0xff]  ;;  %v445_v50 = vpop.permute.xlu1 %444  ;;  %v485_v51 = vld [vmem:[#allocation3] sm:$0xfe] }
 0x1be   : > { %859 = vmatmul.msk.f32.vlgmr.msrb.gmra.mxu2 %vm429_vm5, %v464_v49  ;;  %456 = vst.msk [vmem:[#allocation3 + $0x10] sm:$0xff] %vm455_vm10, %v445_v50  ;;  %v486_v52 = vld [vmem:[#allocation3 + $0x8] sm:$0xfe]  ;;  %v515_v56 = vrot.slane %v485_v51, 1  ;;  %v628_v61 = vld [vmem:[#allocation3] sm:$0xfc] }
 0x1bf   : > { %458 = vst.msk [vmem:[#allocation3 + $0x18] sm:$0xff] %vm457_vm11, %v445_v50  ;;  %v518_v58 = vrot.slane %v486_v52, 1  ;;  %v656_v1 = vrot.slane %v628_v61, 2  ;;  %v629_v9 = vld [vmem:[#allocation3 + $0x8] sm:$0xfc] }
 0x1c0   : > { %v659_v12 = vrot.slane %v629_v9, 2 }
 0x1c5   : > { %v465_v53 = vld [vmem:[#allocation3 + $0x10] sm:$0xff] }
 0x1c6   : > { %v516_v54 = vrot.slane %v465_v53, 1  ;;  %601 = vmatmul.f32.gmra.mxu1 %v465_v53  ;;  %v466_v55 = vld [vmem:[#allocation3 + $0x18] sm:$0xff]  ;;  %v657_v62 = vrot.slane %v465_v53, 2 }
 0x1c7   : > { %v519_v57 = vrot.slane %v466_v55, 1  ;;  %860 = vmatmul.msk.f32.gmra.mxu2 %vm429_vm5, %v466_v55  ;;  %v660_v10 = vrot.slane %v466_v55, 2 }
 0x1c8   : > { %v517_v59 = vsel %vm514_vm12, %v515_v56, %v516_v54  ;;  %v658_v3 = vsel %vm655_vm13, %v656_v1, %v657_v62  ;;  %v522_v6 = vsel %vm514_vm12, %v516_v54, %v521_v4  ;;  %v663_v13 = vsel %vm655_vm13, %v657_v62, %v662_v11 }
 0x1c9   : > { %547 = vmatmul.f32.vlgmr.msra.gmra.mxu3 %v517_v59  ;;  %v520_v60 = vsel %vm514_vm12, %v518_v58, %v519_v57  ;;  %v524_v7 = vsel %vm514_vm12, %v519_v57, %v523_v5  ;;  %v661_v14 = vsel %vm655_vm13, %v659_v12, %v660_v10  ;;  %v665_v17 = vsel %vm655_vm13, %v660_v10, %v664_v16 }
 0x1ca   : > { %857 = vmatmul.msk.f32.vlgmr.msrb.gmra.mxu0 %vm429_vm5, %v520_v60 }
 0x1cf   : > { %688 = vmatmul.f32.vlgmr.msra.gmra.mxu2 %v658_v3 }
 0x1d1   : > { %550 = vmatmul.f32.gmra.mxu3 %v522_v6 }
 0x1d2   : > { %858 = vmatmul.msk.f32.gmra.mxu0 %vm429_vm5, %v524_v7 }
 0x1d9   : > { %691 = vmatmul.f32.vlgmr.msrb.gmra.mxu3 %v663_v13 }
 0x1da   : > { %861 = vmatmul.msk.f32.vlgmr.msra.gmra.mxu0 %vm429_vm5, %v661_v14 }
 0x1e2   : > { %862 = vmatmul.msk.f32.gmra.mxu0 %vm429_vm5, %v665_v17 }
 0x23a   : > { %v599_v23 = vpop.f32.mrf.mxu1 }
 0x241   : > { %v622_v18 = vpop.f32.mrf.mxu2 }
 0x243   : > { %v602_v33 = vpop.f32.mrf.mxu1 }
 0x247   : > { %v571_v0 = vpop.f32.mrf.mxu0 }
 0x24a   : > { %v625_v20 = vpop.f32.mrf.mxu2 }
 0x24c   : > { %v548_v19 = vpop.f32.mrf.mxu3 }
 0x24d   : > { %v572_v22 = vadd.f32 %v571_v0, %v548_v19 }
 0x24f   : > { %v574_v21 = vpop.f32.mrf.mxu0  ;;  %v600_v24 = vadd.f32 %v599_v23, %v572_v22 }
 0x251   : > { %v623_v29 = vadd.f32 %v622_v18, %v600_v24 }
 0x252   : > { %v689_v26 = vpop.f32.mrf.mxu2 }
 0x254   : > { %v551_v25 = vpop.f32.mrf.mxu3 }
 0x255   : > { %v575_v28 = vadd.f32 %v574_v21, %v551_v25 }
 0x257   : > { %v712_v27 = vpop.f32.mrf.mxu0  ;;  %v603_v34 = vadd.f32 %v602_v33, %v575_v28 }
 0x258   : > { %v713_v30 = vadd.f32 %v712_v27, %v689_v26 }
 0x259   : > { %v626_v39 = vadd.f32 %v625_v20, %v603_v34 }
 0x25a   : > { %v718_v32 = vadd.f32 %v713_v30, %v623_v29 }
 0x25c   : > { %v724_v35 = vadd.f32 %v960_v31, %v718_v32  ;;  %v692_v37 = vpop.f32.mrf.mxu3 }
 0x25e   : > { %v726_v36 = vmax.f32 %v724_v35, 0.0 }
 0x25f   : > { %v715_v38 = vpop.f32.mrf.mxu0 }
 0x260   : > { %728 = vst [vmem:[%s277_s27] sm:$0xff] %v726_v36  ;;  %v716_v40 = vadd.f32 %v715_v38, %v692_v37 }
 0x262   : > { %v719_v41 = vadd.f32 %v716_v40, %v626_v39 }
 0x264   : > { %v725_v42 = vadd.f32 %v960_v31, %v719_v41 }
 0x266   : > { %v727_v43 = vmax.f32 %v725_v42, 0.0 }
 0x268   : > { %729 = vst [vmem:[%s277_s27 + $0x8] sm:$0xff] %v727_v43 }
 0x269   : > { %1078 = shalt.err (!%p1075_p10)
}
 0x26a   : > { %s1130_s8 = smov 128  }
 0x26b   : > { %896 = dma.vmem_to_hbm [thread:$0]  (%p1233_p3), %s744_s26, 256, %s746_s16, %s731_s22, %s1130_s8, %s1130_s8, %s1129_s9  }
 0x26c PF: > { %s760_s15 = sand.u32 1, %s1109_s18   ;;  %p1371_p12 = scmp.ge.s32.totalorder %s1121_s21, 2 }
 0x26d   : > { %s761_s27 = scalar_lea.sflag [#allocation6], %s760_s15 }
 0x26e   : > { %p910_p13 = pnand %p1371_p12, %p1196_p6 }
 0x270   : > { %p911_p0 = pneg %p910_p13 }
 0x272   : > { %1104 = dma.done.wait (%p911_p0), %s761_s27, 256  }
 0x273   : > { %1106 = vsyncadd (%p911_p0), %s761_s27, 4294967040  ;;  %p19_p5 = scmp.ge.s32.totalorder %s1223_s14, 4   ;;  %s1372_s18 = smov %s1113_s19 }
 0x274   : > { %s1373_s19 = smov %s1117_s20  ;;  %s1374_s20 = smov %s1239_s23 }
 0x275   : > { %s1375_s21 = smov %s1223_s14  ;;  %21 = sbr.rel (!%p19_p5) target bundleno = 6 (0x6), region = 97 }
 0x27a   :  { %767 = vsyncpa [#allocation5], 1 }
 0x27b   :  { %769 = vsyncpa [#allocation5 + $0x1], 1 }
 0x27c   :  { %770 = vsyncpa [#allocation8], 1 }
 0x27d   :  { %771 = vsyncpa [#allocation6], 1 }
 0x27e   :  { %773 = vsyncpa [#allocation6 + $0x1], 1 }

</bundles_post_ra>
